<compile_context>
chip_gen: v7x
topology: tpu7x:2x2x1
jax: 0.10.0
libtpu: 0.0.40
codegen_flags: <defaults>
</compile_context>

<pallas_src>
import functools
import math

import jax
import jax.numpy as jnp
from jax.experimental import pallas as pl
from jax.experimental.pallas import tpu as pltpu

LEAKY_SLOPE = 0.1


def _leaky(x):
    return jnp.where(x >= 0, x, LEAKY_SLOPE * x)


def _branch_kernel(xw_ref, w1t_ref, ah_ref, awt_ref, o_ref, small_ref, *, kk, h, w):
    """Per-batch branch: max-pool (reduce over kk stacked window offsets),
    1x1 conv on the small pooled map, separable bilinear upsample
    (two small matmuls per channel), LeakyReLU(0.1)."""
    # max-pool reduction over window offsets -> (C, Sp), Sp = h*w on lanes
    pooled = xw_ref[0, 0]
    for t in range(1, kk):
        pooled = jnp.maximum(pooled, xw_ref[0, t])
    # 1x1 conv FIRST, on the small pooled map: (Cb, C) @ (C, Sp) -> (Cb, Sp)
    ys = jnp.dot(w1t_ref[...], pooled, preferred_element_type=jnp.float32)
    # lay (Cb, h*w) out as (Cb, h, w) in VMEM scratch via h cheap row copies
    for hi in range(h):
        small_ref[:, hi, :] = ys[:, hi * w:(hi + 1) * w]
    ah = ah_ref[...]        # (H, h)
    awt = awt_ref[...]      # (w, W)
    cb = small_ref.shape[0]
    for c in range(cb):     # separable bilinear upsample per output channel
        t1 = jnp.dot(ah, small_ref[c], preferred_element_type=jnp.float32)   # (H, w)
        up = jnp.dot(t1, awt, preferred_element_type=jnp.float32)            # (H, W)
        o_ref[0, c] = _leaky(up).astype(o_ref.dtype)


def _fuse_kernel(zp_ref, w3t_ref, wft_ref, o_ref, *, wp):
    """Per-batch fuse: 3x3 conv as 9 lane-shifted taps of the single padded,
    flattened feature block (no im2col), LeakyReLU(0.1), final 1x1 conv."""
    pv = o_ref.shape[2]                                  # H * (W + 2)
    acc = None
    for ty in range(3):
        for tx in range(3):
            t = ty * 3 + tx
            off = ty * wp + tx
            tap = zp_ref[0, :, off:off + pv]             # (Ctot, Pv) lane-offset slice
            d = jnp.dot(w3t_ref[t], tap, preferred_element_type=jnp.float32)
            acc = d if acc is None else acc + d          # (Cout, Pv)
    acc = _leaky(acc)
    y = jnp.dot(wft_ref[...], acc, preferred_element_type=jnp.float32)
    o_ref[0] = y.astype(o_ref.dtype)


def _interp_matrix(out_size, in_size):
    """Rows of 1-D bilinear interpolation weights, align_corners=True (PyTorch)."""
    if in_size == 1:
        return jnp.ones((out_size, 1), jnp.float32)
    denom = max(out_size - 1, 1)
    idx = jnp.arange(out_size, dtype=jnp.float32)
    src = idx * (in_size - 1) / denom
    lo = jnp.clip(jnp.floor(src).astype(jnp.int32), 0, in_size - 2)
    frac = src - lo.astype(jnp.float32)
    rows = jnp.arange(out_size)
    A = jnp.zeros((out_size, in_size), jnp.float32)
    A = A.at[rows, lo].add(1.0 - frac)
    A = A.at[rows, lo + 1].add(frac)
    return A


def _branch_call(xw, w1t, Ah, AwT, H, W):
    N, kk, C, Sp = xw.shape
    Cb = w1t.shape[0]
    h = Ah.shape[1]
    w = AwT.shape[0]
    kern = functools.partial(_branch_kernel, kk=kk, h=h, w=w)
    return pl.pallas_call(
        kern,
        out_shape=jax.ShapeDtypeStruct((N, Cb, H, W), jnp.float32),
        grid=(N,),
        in_specs=[
            pl.BlockSpec((1, kk, C, Sp), lambda n: (n, 0, 0, 0)),
            pl.BlockSpec((Cb, C), lambda n: (0, 0)),
            pl.BlockSpec((H, h), lambda n: (0, 0)),
            pl.BlockSpec((w, W), lambda n: (0, 0)),
        ],
        out_specs=pl.BlockSpec((1, Cb, H, W), lambda n: (n, 0, 0, 0)),
        scratch_shapes=[pltpu.VMEM((Cb, h, w), jnp.float32)],
        compiler_params=pltpu.CompilerParams(
            dimension_semantics=("parallel",),
            vmem_limit_bytes=32 * 1024 * 1024),
    )(xw, w1t, Ah, AwT)


def _fuse_call(zpf, w3t, wft, Wp, Pv):
    N, Ct, P2 = zpf.shape
    Cout = w3t.shape[1]
    kern = functools.partial(_fuse_kernel, wp=Wp)
    return pl.pallas_call(
        kern,
        out_shape=jax.ShapeDtypeStruct((N, Cout, Pv), jnp.float32),
        grid=(N,),
        in_specs=[
            pl.BlockSpec((1, Ct, P2), lambda n: (n, 0, 0)),
            pl.BlockSpec((9, Cout, Ct), lambda n: (0, 0, 0)),
            pl.BlockSpec((Cout, Cout), lambda n: (0, 0)),
        ],
        out_specs=pl.BlockSpec((1, Cout, Pv), lambda n: (n, 0, 0)),
        compiler_params=pltpu.CompilerParams(
            dimension_semantics=("parallel",),
            vmem_limit_bytes=32 * 1024 * 1024),
    )(zpf, w3t, wft)


def spatial_pyramid_pooling(x_nchw, params, kernel_sizes):
    """Pallas forward of SpatialPyramidPooling (pool_func='max', no norm)."""
    N, C, H, W = x_nchw.shape

    branch_feats = [x_nchw]
    for k, w1 in zip(kernel_sizes, params["w1"]):
        h, w = H // k, W // k
        # glue: stack the k*k pooling-window offsets on a leading axis; the
        # kernel reduces max over it.  Channels on sublanes, h*w on lanes.
        xt = x_nchw[:, :, :h * k, :w * k].reshape(N, C, h, k, w, k)
        xw = jnp.transpose(xt, (0, 3, 5, 1, 2, 4)).reshape(N, k * k, C, h * w)
        Ah = _interp_matrix(H, h)            # (H, h)
        AwT = _interp_matrix(W, w).T         # (w, W)
        w1t = w1.T                           # (Cb, C)
        branch_feats.append(_branch_call(xw, w1t, Ah, AwT, H, W))   # (N, Cb, H, W)

    z = jnp.concatenate(branch_feats, axis=1)            # (N, Ctot, H, W)
    Ct = z.shape[1]
    Wp = W + 2
    P = (H + 2) * Wp
    Pv = H * Wp
    # glue: zero-pad spatially once, flatten with padded row stride, +2 tail pad
    # so every in-kernel tap slice (max offset 2*Wp+2) stays in bounds.
    zp = jnp.pad(z, ((0, 0), (0, 0), (1, 1), (1, 1)))
    zpf = jnp.pad(zp.reshape(N, Ct, P), ((0, 0), (0, 0), (0, 2)))
    w3t = jnp.transpose(params["w3"], (0, 2, 1))          # (9, Cout, Ctot)
    wft = params["wf"].T                                  # (Cout, Cout)

    out_flat = _fuse_call(zpf, w3t, wft, Wp, Pv)          # (N, Cout, Pv)
    Cout = out_flat.shape[1]
    # glue: drop the 2 garbage columns coming from the padded row stride.
    return out_flat.reshape(N, Cout, H, Wp)[:, :, :, :W]  # NCHW


def reference_forward(x_nchw, params, kernel_sizes):
    """Plain-JAX reference mirroring the PyTorch module semantics (NCHW)."""
    N, C, H, W = x_nchw.shape
    branches = [x_nchw]
    for k, w1 in zip(kernel_sizes, params["w1"]):
        h, w = H // k, W // k
        xt = x_nchw[:, :, :h * k, :w * k].reshape(N, C, h, k, w, k)
        pooled = xt.max(axis=(3, 5))
        Ah = _interp_matrix(H, h)
        Aw = _interp_matrix(W, w)
        up = jnp.einsum('Hh,nchw,Ww->ncHW', Ah, pooled, Aw)
        y = jnp.einsum('nchw,co->nohw', up, w1)
        y = jnp.where(y >= 0, y, LEAKY_SLOPE * y)
        branches.append(y)
    z = jnp.concatenate(branches, axis=1)
    zp = jnp.pad(z, ((0, 0), (0, 0), (1, 1), (1, 1)))
    Cout = params["wf"].shape[0]
    acc = jnp.zeros((N, Cout, H, W), jnp.float32)
    for ty in range(3):
        for tx in range(3):
            acc = acc + jnp.einsum('nchw,co->nohw',
                                   zp[:, :, ty:ty + H, tx:tx + W],
                                   params["w3"][ty * 3 + tx])
    acc = jnp.where(acc >= 0, acc, LEAKY_SLOPE * acc)
    return jnp.einsum('nchw,co->nohw', acc, params["wf"])


if __name__ == "__main__":
    in_channels = 4
    out_channels = 4
    kernel_sizes = [2, 4]
    N, H, W = 2, 16, 16
    Cb = out_channels // len(kernel_sizes)                  # per-branch channels
    Ctot = in_channels + len(kernel_sizes) * Cb
    # The torch module's conv_fuse expects 2 * len(kernel_sizes) * Cb inputs,
    # which requires in_channels == len(kernel_sizes) * Cb.
    assert Ctot == 2 * len(kernel_sizes) * Cb

    key = jax.random.PRNGKey(0)
    keys = jax.random.split(key, len(kernel_sizes) + 3)
    x = jax.random.normal(keys[0], (N, in_channels, H, W), jnp.float32)

    # Deterministic kaiming-uniform-style init (synthetic weights, bias-free).
    w1_list = []
    b1 = 1.0 / math.sqrt(in_channels)
    for i in range(len(kernel_sizes)):
        w1_list.append(jax.random.uniform(
            keys[1 + i], (in_channels, Cb), jnp.float32, -b1, b1))
    b3 = 1.0 / math.sqrt(Ctot * 9)
    w3 = jax.random.uniform(keys[-2], (9, Ctot, out_channels), jnp.float32, -b3, b3)
    bf = 1.0 / math.sqrt(out_channels)
    wf = jax.random.uniform(keys[-1], (out_channels, out_channels), jnp.float32, -bf, bf)
    params = {"w1": w1_list, "w3": w3, "wf": wf}

    out = spatial_pyramid_pooling(x, params, kernel_sizes)
    out = jax.block_until_ready(out)

    ref = reference_forward(x, params, kernel_sizes)
    assert out.shape == (N, out_channels, H, W), out.shape
    max_err = float(jnp.max(jnp.abs(out - ref)))
    assert jnp.allclose(out, ref, rtol=1e-4, atol=1e-4), max_err
    print("KERNEL_OK")
</pallas_src>

<mosaic_0001>
module attributes {stable_mosaic.version = 11 : i64} {
  func.func @_branch_kernel(%arg0: i32, %arg1: memref<1x4x4x64xf32, #tpu.memory_space<vmem>>, %arg2: memref<2x4xf32, #tpu.memory_space<vmem>>, %arg3: memref<16x8xf32, #tpu.memory_space<vmem>>, %arg4: memref<8x16xf32, #tpu.memory_space<vmem>>, %arg5: memref<1x2x16x16xf32, #tpu.memory_space<vmem>>, %arg6: memref<2x8x8xf32, #tpu.memory_space<vmem>>) attributes {dimension_semantics = [#tpu.dimension_semantics<parallel>], iteration_bounds = array<i64: 2>, scalar_prefetch = 0 : i64, scratch_operands = 1 : i64, tpu.core_type = #tpu.core_type<tc>, window_params = [{transform_indices = @transform_0, window_bounds = array<i64: 1, 4, 4, 64>}, {pipeline_mode = #tpu.pipeline_mode<synchronous>, transform_indices = @transform_1, window_bounds = array<i64: 2, 4>}, {pipeline_mode = #tpu.pipeline_mode<synchronous>, transform_indices = @transform_2, window_bounds = array<i64: 16, 8>}, {pipeline_mode = #tpu.pipeline_mode<synchronous>, transform_indices = @transform_3, window_bounds = array<i64: 8, 16>}, {transform_indices = @transform_4, window_bounds = array<i64: 1, 2, 16, 16>}]} {
    %c0 = arith.constant 0 : index
    %c0_0 = arith.constant 0 : index
    %c0_1 = arith.constant 0 : index
    %c0_2 = arith.constant 0 : index
    %0 = vector.load %arg1[%c0, %c0_0, %c0_1, %c0_2] : memref<1x4x4x64xf32, #tpu.memory_space<vmem>>, vector<1x1x4x64xf32>
    %1 = vector.shape_cast %0 : vector<1x1x4x64xf32> to vector<4x64xf32>
    %c0_3 = arith.constant 0 : index
    %c1 = arith.constant 1 : index
    %c0_4 = arith.constant 0 : index
    %c0_5 = arith.constant 0 : index
    %2 = vector.load %arg1[%c0_3, %c1, %c0_4, %c0_5] : memref<1x4x4x64xf32, #tpu.memory_space<vmem>>, vector<1x1x4x64xf32>
    %3 = vector.shape_cast %2 : vector<1x1x4x64xf32> to vector<4x64xf32>
    %4 = arith.maximumf %1, %3 : vector<4x64xf32>
    %c0_6 = arith.constant 0 : index
    %c2 = arith.constant 2 : index
    %c0_7 = arith.constant 0 : index
    %c0_8 = arith.constant 0 : index
    %5 = vector.load %arg1[%c0_6, %c2, %c0_7, %c0_8] : memref<1x4x4x64xf32, #tpu.memory_space<vmem>>, vector<1x1x4x64xf32>
    %6 = vector.shape_cast %5 : vector<1x1x4x64xf32> to vector<4x64xf32>
    %7 = arith.maximumf %4, %6 : vector<4x64xf32>
    %c0_9 = arith.constant 0 : index
    %c3 = arith.constant 3 : index
    %c0_10 = arith.constant 0 : index
    %c0_11 = arith.constant 0 : index
    %8 = vector.load %arg1[%c0_9, %c3, %c0_10, %c0_11] : memref<1x4x4x64xf32, #tpu.memory_space<vmem>>, vector<1x1x4x64xf32>
    %9 = vector.shape_cast %8 : vector<1x1x4x64xf32> to vector<4x64xf32>
    %10 = arith.maximumf %7, %9 : vector<4x64xf32>
    %c0_12 = arith.constant 0 : index
    %c0_13 = arith.constant 0 : index
    %11 = vector.load %arg2[%c0_12, %c0_13] : memref<2x4xf32, #tpu.memory_space<vmem>>, vector<2x4xf32>
    %cst = arith.constant dense<0.000000e+00> : vector<2x64xf32>
    %12 = tpu.matmul %11, %10, %cst {dimension_numbers = #tpu.dot_dimension_numbers<[1], [0], [0], [1], [0, 0, 1, 1], [], []>} : vector<2x4xf32>, vector<4x64xf32>, vector<2x64xf32> -> vector<2x64xf32>
    %13 = vector.extract_strided_slice %12 {offsets = [0, 0], sizes = [2, 8], strides = [1, 1]} : vector<2x64xf32> to vector<2x8xf32>
    %c0_14 = arith.constant 0 : index
    %c0_15 = arith.constant 0 : index
    %c0_16 = arith.constant 0 : index
    %14 = vector.load %arg6[%c0_14, %c0_15, %c0_16] : memref<2x8x8xf32, #tpu.memory_space<vmem>>, vector<2x1x8xf32>
    %15 = vector.shape_cast %14 : vector<2x1x8xf32> to vector<2x8xf32>
    %16 = vector.shape_cast %13 : vector<2x8xf32> to vector<2x1x8xf32>
    tpu.vector_store %arg6[%c0_14, %c0_15, %c0_16], %16 {strides = array<i32>} : memref<2x8x8xf32, #tpu.memory_space<vmem>>, vector<2x1x8xf32>,
    %17 = vector.extract_strided_slice %12 {offsets = [0, 8], sizes = [2, 8], strides = [1, 1]} : vector<2x64xf32> to vector<2x8xf32>
    %c0_17 = arith.constant 0 : index
    %c1_18 = arith.constant 1 : index
    %c0_19 = arith.constant 0 : index
    %18 = vector.load %arg6[%c0_17, %c1_18, %c0_19] : memref<2x8x8xf32, #tpu.memory_space<vmem>>, vector<2x1x8xf32>
    %19 = vector.shape_cast %18 : vector<2x1x8xf32> to vector<2x8xf32>
    %20 = vector.shape_cast %17 : vector<2x8xf32> to vector<2x1x8xf32>
    tpu.vector_store %arg6[%c0_17, %c1_18, %c0_19], %20 {strides = array<i32>} : memref<2x8x8xf32, #tpu.memory_space<vmem>>, vector<2x1x8xf32>,
    %21 = vector.extract_strided_slice %12 {offsets = [0, 16], sizes = [2, 8], strides = [1, 1]} : vector<2x64xf32> to vector<2x8xf32>
    %c0_20 = arith.constant 0 : index
    %c2_21 = arith.constant 2 : index
    %c0_22 = arith.constant 0 : index
    %22 = vector.load %arg6[%c0_20, %c2_21, %c0_22] : memref<2x8x8xf32, #tpu.memory_space<vmem>>, vector<2x1x8xf32>
    %23 = vector.shape_cast %22 : vector<2x1x8xf32> to vector<2x8xf32>
    %24 = vector.shape_cast %21 : vector<2x8xf32> to vector<2x1x8xf32>
    tpu.vector_store %arg6[%c0_20, %c2_21, %c0_22], %24 {strides = array<i32>} : memref<2x8x8xf32, #tpu.memory_space<vmem>>, vector<2x1x8xf32>,
    %25 = vector.extract_strided_slice %12 {offsets = [0, 24], sizes = [2, 8], strides = [1, 1]} : vector<2x64xf32> to vector<2x8xf32>
    %c0_23 = arith.constant 0 : index
    %c3_24 = arith.constant 3 : index
    %c0_25 = arith.constant 0 : index
    %26 = vector.load %arg6[%c0_23, %c3_24, %c0_25] : memref<2x8x8xf32, #tpu.memory_space<vmem>>, vector<2x1x8xf32>
    %27 = vector.shape_cast %26 : vector<2x1x8xf32> to vector<2x8xf32>
    %28 = vector.shape_cast %25 : vector<2x8xf32> to vector<2x1x8xf32>
    tpu.vector_store %arg6[%c0_23, %c3_24, %c0_25], %28 {strides = array<i32>} : memref<2x8x8xf32, #tpu.memory_space<vmem>>, vector<2x1x8xf32>,
    %29 = vector.extract_strided_slice %12 {offsets = [0, 32], sizes = [2, 8], strides = [1, 1]} : vector<2x64xf32> to vector<2x8xf32>
    %c0_26 = arith.constant 0 : index
    %c4 = arith.constant 4 : index
    %c0_27 = arith.constant 0 : index
    %30 = vector.load %arg6[%c0_26, %c4, %c0_27] : memref<2x8x8xf32, #tpu.memory_space<vmem>>, vector<2x1x8xf32>
    %31 = vector.shape_cast %30 : vector<2x1x8xf32> to vector<2x8xf32>
    %32 = vector.shape_cast %29 : vector<2x8xf32> to vector<2x1x8xf32>
    tpu.vector_store %arg6[%c0_26, %c4, %c0_27], %32 {strides = array<i32>} : memref<2x8x8xf32, #tpu.memory_space<vmem>>, vector<2x1x8xf32>,
    %33 = vector.extract_strided_slice %12 {offsets = [0, 40], sizes = [2, 8], strides = [1, 1]} : vector<2x64xf32> to vector<2x8xf32>
    %c0_28 = arith.constant 0 : index
    %c5 = arith.constant 5 : index
    %c0_29 = arith.constant 0 : index
    %34 = vector.load %arg6[%c0_28, %c5, %c0_29] : memref<2x8x8xf32, #tpu.memory_space<vmem>>, vector<2x1x8xf32>
    %35 = vector.shape_cast %34 : vector<2x1x8xf32> to vector<2x8xf32>
    %36 = vector.shape_cast %33 : vector<2x8xf32> to vector<2x1x8xf32>
    tpu.vector_store %arg6[%c0_28, %c5, %c0_29], %36 {strides = array<i32>} : memref<2x8x8xf32, #tpu.memory_space<vmem>>, vector<2x1x8xf32>,
    %37 = vector.extract_strided_slice %12 {offsets = [0, 48], sizes = [2, 8], strides = [1, 1]} : vector<2x64xf32> to vector<2x8xf32>
    %c0_30 = arith.constant 0 : index
    %c6 = arith.constant 6 : index
    %c0_31 = arith.constant 0 : index
    %38 = vector.load %arg6[%c0_30, %c6, %c0_31] : memref<2x8x8xf32, #tpu.memory_space<vmem>>, vector<2x1x8xf32>
    %39 = vector.shape_cast %38 : vector<2x1x8xf32> to vector<2x8xf32>
    %40 = vector.shape_cast %37 : vector<2x8xf32> to vector<2x1x8xf32>
    tpu.vector_store %arg6[%c0_30, %c6, %c0_31], %40 {strides = array<i32>} : memref<2x8x8xf32, #tpu.memory_space<vmem>>, vector<2x1x8xf32>,
    %41 = vector.extract_strided_slice %12 {offsets = [0, 56], sizes = [2, 8], strides = [1, 1]} : vector<2x64xf32> to vector<2x8xf32>
    %c0_32 = arith.constant 0 : index
    %c7 = arith.constant 7 : index
    %c0_33 = arith.constant 0 : index
    %42 = vector.load %arg6[%c0_32, %c7, %c0_33] : memref<2x8x8xf32, #tpu.memory_space<vmem>>, vector<2x1x8xf32>
    %43 = vector.shape_cast %42 : vector<2x1x8xf32> to vector<2x8xf32>
    %44 = vector.shape_cast %41 : vector<2x8xf32> to vector<2x1x8xf32>
    tpu.vector_store %arg6[%c0_32, %c7, %c0_33], %44 {strides = array<i32>} : memref<2x8x8xf32, #tpu.memory_space<vmem>>, vector<2x1x8xf32>,
    %c0_34 = arith.constant 0 : index
    %c0_35 = arith.constant 0 : index
    %45 = vector.load %arg3[%c0_34, %c0_35] : memref<16x8xf32, #tpu.memory_space<vmem>>, vector<16x8xf32>
    %c0_36 = arith.constant 0 : index
    %c0_37 = arith.constant 0 : index
    %46 = vector.load %arg4[%c0_36, %c0_37] : memref<8x16xf32, #tpu.memory_space<vmem>>, vector<8x16xf32>
    %c0_38 = arith.constant 0 : index
    %c0_39 = arith.constant 0 : index
    %c0_40 = arith.constant 0 : index
    %47 = vector.load %arg6[%c0_38, %c0_39, %c0_40] : memref<2x8x8xf32, #tpu.memory_space<vmem>>, vector<1x8x8xf32>
    %48 = vector.shape_cast %47 : vector<1x8x8xf32> to vector<8x8xf32>
    %cst_41 = arith.constant dense<0.000000e+00> : vector<16x8xf32>
    %49 = tpu.matmul %45, %48, %cst_41 {dimension_numbers = #tpu.dot_dimension_numbers<[1], [0], [0], [1], [0, 0, 1, 1], [], []>} : vector<16x8xf32>, vector<8x8xf32>, vector<16x8xf32> -> vector<16x8xf32>
    %cst_42 = arith.constant dense<0.000000e+00> : vector<16x16xf32>
    %50 = tpu.matmul %49, %46, %cst_42 {dimension_numbers = #tpu.dot_dimension_numbers<[1], [0], [0], [1], [0, 0, 1, 1], [], []>} : vector<16x8xf32>, vector<8x16xf32>, vector<16x16xf32> -> vector<16x16xf32>
    %cst_43 = arith.constant 0.000000e+00 : f32
    %51 = vector.broadcast %cst_43 : f32 to vector<16x16xf32>
    %52 = arith.cmpf oge, %50, %51 : vector<16x16xf32>
    %cst_44 = arith.constant 1.000000e-01 : f32
    %53 = vector.broadcast %cst_44 : f32 to vector<16x16xf32>
    %54 = arith.mulf %53, %50 : vector<16x16xf32>
    %55 = arith.select %52, %50, %54 : vector<16x16xi1>, vector<16x16xf32>
    %c0_45 = arith.constant 0 : index
    %c0_46 = arith.constant 0 : index
    %c0_47 = arith.constant 0 : index
    %c0_48 = arith.constant 0 : index
    %56 = vector.load %arg5[%c0_45, %c0_46, %c0_47, %c0_48] : memref<1x2x16x16xf32, #tpu.memory_space<vmem>>, vector<1x1x16x16xf32>
    %57 = vector.shape_cast %56 : vector<1x1x16x16xf32> to vector<16x16xf32>
    %58 = vector.shape_cast %55 : vector<16x16xf32> to vector<1x1x16x16xf32>
    tpu.vector_store %arg5[%c0_45, %c0_46, %c0_47, %c0_48], %58 {strides = array<i32>} : memref<1x2x16x16xf32, #tpu.memory_space<vmem>>, vector<1x1x16x16xf32>,
    %c1_49 = arith.constant 1 : index
    %c0_50 = arith.constant 0 : index
    %c0_51 = arith.constant 0 : index
    %59 = vector.load %arg6[%c1_49, %c0_50, %c0_51] : memref<2x8x8xf32, #tpu.memory_space<vmem>>, vector<1x8x8xf32>
    %60 = vector.shape_cast %59 : vector<1x8x8xf32> to vector<8x8xf32>
    %cst_52 = arith.constant dense<0.000000e+00> : vector<16x8xf32>
    %61 = tpu.matmul %45, %60, %cst_52 {dimension_numbers = #tpu.dot_dimension_numbers<[1], [0], [0], [1], [0, 0, 1, 1], [], []>} : vector<16x8xf32>, vector<8x8xf32>, vector<16x8xf32> -> vector<16x8xf32>
    %cst_53 = arith.constant dense<0.000000e+00> : vector<16x16xf32>
    %62 = tpu.matmul %61, %46, %cst_53 {dimension_numbers = #tpu.dot_dimension_numbers<[1], [0], [0], [1], [0, 0, 1, 1], [], []>} : vector<16x8xf32>, vector<8x16xf32>, vector<16x16xf32> -> vector<16x16xf32>
    %cst_54 = arith.constant 0.000000e+00 : f32
    %63 = vector.broadcast %cst_54 : f32 to vector<16x16xf32>
    %64 = arith.cmpf oge, %62, %63 : vector<16x16xf32>
    %cst_55 = arith.constant 1.000000e-01 : f32
    %65 = vector.broadcast %cst_55 : f32 to vector<16x16xf32>
    %66 = arith.mulf %65, %62 : vector<16x16xf32>
    %67 = arith.select %64, %62, %66 : vector<16x16xi1>, vector<16x16xf32>
    %c0_56 = arith.constant 0 : index
    %c1_57 = arith.constant 1 : index
    %c0_58 = arith.constant 0 : index
    %c0_59 = arith.constant 0 : index
    %68 = vector.load %arg5[%c0_56, %c1_57, %c0_58, %c0_59] : memref<1x2x16x16xf32, #tpu.memory_space<vmem>>, vector<1x1x16x16xf32>
    %69 = vector.shape_cast %68 : vector<1x1x16x16xf32> to vector<16x16xf32>
    %70 = vector.shape_cast %67 : vector<16x16xf32> to vector<1x1x16x16xf32>
    tpu.vector_store %arg5[%c0_56, %c1_57, %c0_58, %c0_59], %70 {strides = array<i32>} : memref<1x2x16x16xf32, #tpu.memory_space<vmem>>, vector<1x1x16x16xf32>,
    return
  }
  func.func @transform_0(%arg0: i32) -> (i32, i32, i32, i32) {
    %c0_i32 = arith.constant 0 : i32
    %c0_i32_0 = arith.constant 0 : i32
    %c0_i32_1 = arith.constant 0 : i32
    %c0_i32_2 = arith.constant 0 : i32
    return %arg0, %c0_i32, %c0_i32_0, %c0_i32_1 : i32, i32, i32, i32
  }
  func.func @transform_1(%arg0: i32) -> (i32, i32) {
    %c0_i32 = arith.constant 0 : i32
    %c0_i32_0 = arith.constant 0 : i32
    %c0_i32_1 = arith.constant 0 : i32
    return %c0_i32, %c0_i32_0 : i32, i32
  }
  func.func @transform_2(%arg0: i32) -> (i32, i32) {
    %c0_i32 = arith.constant 0 : i32
    %c0_i32_0 = arith.constant 0 : i32
    %c0_i32_1 = arith.constant 0 : i32
    return %c0_i32, %c0_i32_0 : i32, i32
  }
  func.func @transform_3(%arg0: i32) -> (i32, i32) {
    %c0_i32 = arith.constant 0 : i32
    %c0_i32_0 = arith.constant 0 : i32
    %c0_i32_1 = arith.constant 0 : i32
    return %c0_i32, %c0_i32_0 : i32, i32
  }
  func.func @transform_4(%arg0: i32) -> (i32, i32, i32, i32) {
    %c0_i32 = arith.constant 0 : i32
    %c0_i32_0 = arith.constant 0 : i32
    %c0_i32_1 = arith.constant 0 : i32
    %c0_i32_2 = arith.constant 0 : i32
    return %arg0, %c0_i32, %c0_i32_0, %c0_i32_1 : i32, i32, i32, i32
  }
}

</mosaic_0001>

<bundles_post_ra>
// kernel: tpu_custom_call.1
= control target key start
LH: loop header
LB: loop body
LE: loop exit
PB: predicated region body
PF: predicated region fallthrough
CT: control target
= control target key end

     0   :  { %9 = vsyncpa [#allocation4], 0  ;;  %s1299_s0 = inlined_call_operand.hbm [shape: f32[2,4,4,64], index: 0, kind: input, shape index: {}]   ;;  %s1300_s1 = inlined_call_operand.vmem [shape: f32[2,4], index: 1, kind: input, shape index: {}]   ;;  %s1301_s2 = inlined_call_operand.vmem [shape: f32[16,8], index: 2, kind: input, shape index: {}]   ;;  %s1302_s3 = inlined_call_operand.vmem [shape: f32[8,16], index: 3, kind: input, shape index: {}]   ;;  %s1303_s4 = inlined_call_operand.hbm [shape: f32[2,2,16,16], index: 4, kind: output, shape index: {}]  }
   0x1   :  { %11 = vsyncpa [#allocation4 + $0x1], 0 }
   0x2   :  { %12 = vsyncpa [#allocation5], 0 }
   0x3   :  { %14 = vsyncpa [#allocation5 + $0x1], 0  ;;  %s1096_s15 = smov 0   ;;  %s1098_s16 = smov 0  }
   0x4   :  { %s1100_s17 = smov 0   ;;  %s1102_s18 = smov 0  }
   0x5 LB: > { %s1117_s19 = sadd.s32 4294967295, %s1053_s18   ;;  %s827_s20 = sadd.s32 4294967294, %s1053_s18   ;;  %s1053_s18 = sphi %s1102_s18, %s1316_s18   ;;  %s1049_s17 = sphi %s1100_s17, %s1315_s17   ;;  %s1045_s16 = sphi %s1098_s16, %s1314_s16   ;;  %s1041_s15 = sphi %s1096_s15, %s1313_s15  }
   0x6   : > { %s1121_s21 = sadd.s32 1, %s1053_s18   ;;  %s27_s22 = sadd.s32 1, %s1049_s17 }
   0x7   : > { %s24_s23 = ssub.s32 %s1053_s18, %s1121_s21  ;;  %p34_p0 = scmp.ne.s32.totalorder %s1049_s17, %s1045_s16 }
   0x8   : > { %p25_p1 = scmp.eq.s32.totalorder %s24_s23, 0  ;;  %p35_p2 = scmp.eq.s32.totalorder %s1053_s18, 0 }
   0x9   : > { %p40_p3 = scmp.ne.s32.totalorder %s1045_s16, %s1041_s15  ;;  %p41_p4 = scmp.eq.s32.totalorder %s1117_s19, 0 }
   0xa   : > { %s1133_s24 = scalar_select %p25_p1, %s1049_s17, %s27_s22  }
   0xb   : > { %p1135_p5 = por %p35_p2, %p34_p0  ;;  %p1139_p6 = por %p41_p4, %p40_p3 }
   0xc   : > { %p127_p7 = scmp.eq.s32.totalorder %s1117_s19, 1  ;;  %p133_p8 = scmp.eq.s32.totalorder %s827_s20, 1 }
   0xd   : > { %p909_p10 = scmp.lt.s32.totalorder %s1053_s18, 2  ;;  %s162_s29 = sand.u32 1, %s1049_s17  }
   0xe   : > { %p1146_p11 = por %p127_p7, %p34_p0  ;;  %p1150_p12 = por %p133_p8, %p40_p3 }
   0xf   : > { %s856_s30 = sshll.u32 %s1053_s18, 8  ;;  %s830_s5 = sshll.u32 %s162_s29, 4 }
  0x10   : > { %s1307_s27 = scalar_select %p1146_p11, 1, 0 }
  0x11   : > { %s1308_s28 = scalar_select %p1150_p12, 1, 0 }
  0x12   : > { %s1159_s8 = scalar_lea.hbm %s1299_s0, %s856_s30  ;;  %s166_s9 = scalar_lea.vmem [#allocation3], %s830_s5 }
  0x13   : > { %s173_s10 = sshll.u32 %s166_s9, 4  ;;  %p1163_p13 = pnand %p909_p10, %p1135_p5  ;;  %s1167_s10 = int_to_ptr.vmem [resolvable:$true] %s173_s10 }
  0x14   : > { %s1169_s12 = scalar_lea.sflag [#allocation4], %s162_s29  ;;  %s957_s13 = scalar_lea.hbm %s1159_s8, 256 }
  0x15   : > { %p958_p0 = scmp.ne.s32.totalorder %s1159_s8, %s957_s13  ;;  %p959_p1 = pneg %p1163_p13 }
  0x16   : > { %s962_s22 = scalar_lea.hbm %s1299_s0, 512  ;;  %p963_p4 = scmp.lt.u32.totalorder %s1159_s8, %s1299_s0 }
  0x17   : > { %p960_p2 = pnand %p959_p1, %p958_p0  ;;  %p964_p5 = scmp.lt.u32.totalorder %s962_s22, %s957_s13 }
  0x18   : > { %p966_p8 = scmp.lt.u32.totalorder %s957_s13, %s1159_s8 }
  0x19   : > { %p961_p3 = pneg %p960_p2  ;;  %p965_p7 = por %p964_p5, %p963_p4 }
  0x1b   : > { %p967_p10 = por %p966_p8, %p965_p7 }
  0x1d   : > { %p968_p9 = pnand %p967_p10, %p961_p3 }
  0x1f   : > { %971 = shalt.err (!%p968_p9)
}
  0x20   : > { %s972_s29 = scalar_lea.vmem %s1167_s10, 256  ;;  %s1055_s30 = smov [#allocation3]  }
  0x21   : > { %p973_p0 = scmp.ne.s32.totalorder %s1167_s10, %s972_s29  ;;  %s977_s5 = sshll.u32 %s1055_s30, 4  ;;  %s978_s5 = int_to_ptr.vmem [resolvable:$false] %s977_s5 }
  0x22   : > { %s979_s6 = scalar_lea.vmem %s978_s5, 512  ;;  %p980_p11 = scmp.lt.s32.totalorder %s1167_s10, %s978_s5 }
  0x23   : > { %p975_p2 = pnand %p973_p0, %p959_p1  ;;  %p981_p4 = scmp.lt.s32.totalorder %s979_s6, %s972_s29 }
  0x25   : > { %p976_p12 = pneg %p975_p2  ;;  %p982_p5 = por %p981_p4, %p980_p11 }
  0x27   : > { %p983_p7 = pnand %p982_p5, %p976_p12 }
  0x29   : > { %986 = shalt.err (!%p983_p7)
}
  0x2a   : > { %s1056_s7 = smov 64   ;;  %s1057_s9 = smov 4  }
  0x2b   : > { %904 = dma.hbm_to_vmem [thread:$0]  (!%p1163_p13), %s1159_s8, 256, %s1167_s10, %s1169_s12, %s1056_s7, %s1056_s7, %s1057_s9  }
  0x2c   : > { %p833_p9 = scmp.ge.s32.totalorder %s1053_s18, 1  ;;  %p181_p1 = scmp.lt.s32.totalorder %s1053_s18, 3 }
  0x2e   : > { %p182_p3 = pnand %p833_p9, %p181_p1 }
  0x2f   : > { %s1200_s13 = sand.u32 (!%p182_p3), 1, %s1045_s16  }
  0x30   : > { %185 = sbr.rel (%p182_p3) target bundleno = 877 (0x36d), region = 36  ;;  %s834_s14 = sshll.u32 (!%p182_p3), %s1200_s13, 4 }
  0x31   : > { %s188_s20 = scalar_lea.sflag (!%p182_p3), [#allocation4], %s1200_s13  ;;  %s191_s22 = scalar_lea.vmem (!%p182_p3), [#allocation3], %s834_s14 }
  0x37   : > { %1032 = dma.done.wait (%p1139_p6), %s188_s20, 256  }
  0x38   : > { %1034 = vsyncadd (%p1139_p6), %s188_s20, 4294967040  ;;  %v1058_v0 = vmov 0.0   ;;  %vm1059_vm0 = vmmov 0   ;;  %v216_v1 = vld [vmem:[%s191_s22] sm:$0xf]  ;;  %vm231_vm1 = vcmask 1043456   ;;  %v309_v11 = vlaneseq }
  0x39   : > { %872 = vmatprep.subr.mxu0 %v1058_v0  ;;  %874 = vmatprep.mubr.msk.f32.mxu0 %vm1059_vm0, %v1058_v0  ;;  %v836_v2 = vld [vmem:[%s191_s22 + $0x4] sm:$0xf]  ;;  %v837_v3 = vld [vmem:[%s191_s22 + $0x8] sm:$0xf]  ;;  %v838_v5 = vld [vmem:[%s191_s22 + $0xc] sm:$0xf] }
  0x3a   : > { %v219_v4 = vmax.f32 %v216_v1, %v836_v2  ;;  %v226_v8 = vld [vmem:[%s1300_s1] sm:$0x3]  ;;  %vm227_vm2 = vcmask 31744   ;;  %v1060_v9 = vmov 1966171168   ;;  %v310_v13 = vshrl.u32 %v309_v11, 7 }
  0x3b   : > { %v307_v10 = vunpack.c.l.s4 %v1060_v9  ;;  %vm330_vm3 = vcmask 57344   ;;  %s1061_s26 = smov 104   ;;  %s1062_s11 = smov 120   ;;  %v397_v24 = vld [vmem:[%s1301_s2] sm:$0xff]  ;;  %vm401_vm4 = vcmask 64512   ;;  %v398_v38 = vld [vmem:[%s1301_s2 + $0x8] sm:$0xff] }
  0x3c   : > { %v222_v6 = vmax.f32 %v219_v4, %v837_v3  ;;  %v335_v17 = vsub.s32 0, %v310_v13  ;;  %s1063_s12 = smov 96   ;;  %s1064_s23 = smov 112   ;;  %879 = vmatprep.mubr.msk.f32.mxu1 %vm401_vm4, %v397_v24  ;;  %v399_v42 = vld [vmem:[%s1302_s3] sm:$0xff]  ;;  %vm570_vm6 = vcmask 130048  }
  0x3d   : > { %v308_v12 = vunpack.c.0.s8 %v307_v10  ;;  %s1065_s25 = smov 80   ;;  %s1066_s29 = smov 88  }
  0x3e   : > { %v225_v7 = vmax.f32 %v222_v6, %v838_v5  ;;  %s1067_s6 = smov 72   ;;  %s835_s22 = sshll.u32 %s1200_s13, 5 }
  0x3f   : > { %v311_v14 = vsub.s32 %v308_v12, %v310_v13  ;;  %s215_s8 = scalar_lea.vmem [#allocation6], %s835_s22  ;;  %p1310_p11 = scmp.ne.s32.totalorder %s1307_s27, 0 }
  0x40   : > { %873 = vmatpush3.msk.msra.mxu0 %vm231_vm1, %v225_v7  ;;  %s754_s10 = sshll.u32 %s215_s8, 4  ;;  %s1248_s10 = int_to_ptr.vmem [resolvable:$true] %s754_s10 }
  0x41   : > { %875 = vmatmul.mubr.msk.f32.vlgmr.msra.gmra.mrb[0].mxu0 %vm227_vm2, %v226_v8  ;;  %882 = vmatprep.subr.mxu0 %v399_v42 }
  0x42   : > { %883 = vmatpush3.msra.mxu0 %v399_v42 }
  0x43   : > { %892 = vmatprep.subr.mxu0 %v399_v42 }
 0x114   : > { %v301_v15 = vpop.f32.mrb[0].mxu0 }
 0x115   : > { %v312_v16 = vrot.slane %v301_v15, %v311_v14  ;;  %v876_v18 = vpop.f32.mrb[1].mxu0 }
 0x117   : > { %v313_v19 = vcombine.high %v312_v16, %v312_v16  ;;  %v320_v20 = vrot.slane %v312_v16, %v311_v14 }
 0x119   : > { %v327_v21 = vrot.slane %v313_v19, %v311_v14  ;;  %331 = vst.msk [vmem:[#allocation2] sm:$0x1] %vm330_vm3, %v320_v20  ;;  %v336_v22 = vrot.slane %v320_v20, %v335_v17 }
 0x11b   : > { %332 = vst.msk [vmem:[#allocation2 + $0x8] sm:$0x1] %vm330_vm3, %v327_v21  ;;  %357 = vrot.lane.b32.xlu1 %v336_v22, %s1061_s26  ;;  %341 = vrot.lane.b32.xlu0 %v336_v22, %s1062_s11  ;;  %v340_v23 = vrot.slane %v327_v21, %v335_v17 }
 0x11f   : > { %365 = vrot.lane.b32.xlu1 %v336_v22, %s1063_s12  ;;  %349 = vrot.lane.b32.xlu0 %v336_v22, %s1064_s23 }
 0x123   : > { %381 = vrot.lane.b32.xlu1 %v336_v22, %s1065_s25  ;;  %373 = vrot.lane.b32.xlu0 %v336_v22, %s1066_s29 }
 0x127   : > { %389 = vrot.lane.b32.xlu0 %v336_v22, %s1067_s6  ;;  %343 = vrot.lane.b32.xlu1 %v340_v23, %s1062_s11 }
 0x12b   : > { %351 = vrot.lane.b32.xlu0 %v340_v23, %s1064_s23  ;;  %359 = vrot.lane.b32.xlu1 %v340_v23, %s1061_s26  ;;  %s857_s26 = sshll.u32 %s1117_s19, 9  ;;  %s741_s19 = scalar_lea.sflag [#allocation5], %s1200_s13 }
 0x12c   : > { %s1253_s23 = scalar_lea.hbm %s1303_s4, %s857_s26 }
 0x12f   : > { %367 = vrot.lane.b32.xlu0 %v340_v23, %s1063_s12  ;;  %375 = vrot.lane.b32.xlu1 %v340_v23, %s1066_s29  ;;  %s1068_s29 = smov [#allocation6]  }
 0x130   : > { %s991_s30 = sshll.u32 %s1068_s29, 4  ;;  %s992_s30 = int_to_ptr.vmem [resolvable:$false] %s991_s30 }
 0x131   : > { %s993_s5 = scalar_lea.vmem %s992_s30, 1024  ;;  %p994_p8 = scmp.lt.s32.totalorder %s1248_s10, %s992_s30 }
 0x133   : > { %383 = vrot.lane.b32.xlu0 %v340_v23, %s1065_s25  ;;  %391 = vrot.lane.b32.xlu1 %v340_v23, %s1067_s6  ;;  %s987_s25 = scalar_lea.vmem %s1248_s10, 512 }
 0x134   : > { %p988_p6 = scmp.ne.s32.totalorder %s1248_s10, %s987_s25  ;;  %p995_p10 = scmp.lt.s32.totalorder %s993_s5, %s987_s25 }
 0x136   : > { %p989_p12 = pnand %p988_p6, %p1310_p11  ;;  %p996_p0 = por %p995_p10, %p994_p8 }
 0x138   : > { %p990_p13 = pneg %p989_p12 }
 0x13a   : > { %p997_p2 = pnand %p996_p0, %p990_p13 }
 0x18d   : > { %v358_v25 = vpop.permute.xlu1 %357  ;;  %v342_v26 = vpop.permute.xlu0 %341 }
 0x18e   : > { %363 = vst.msk [vmem:[#allocation2 + $0x3] sm:$0x1] %vm330_vm3, %v358_v25  ;;  %347 = vst.msk [vmem:[#allocation2 + $0x1] sm:$0x1] %vm330_vm3, %v342_v26 }
 0x191   : > { %v366_v27 = vpop.permute.xlu1 %365  ;;  %v350_v28 = vpop.permute.xlu0 %349 }
 0x192   : > { %371 = vst.msk [vmem:[#allocation2 + $0x4] sm:$0x1] %vm330_vm3, %v366_v27  ;;  %355 = vst.msk [vmem:[#allocation2 + $0x2] sm:$0x1] %vm330_vm3, %v350_v28 }
 0x195   : > { %v382_v29 = vpop.permute.xlu1 %381  ;;  %v374_v30 = vpop.permute.xlu0 %373 }
 0x196   : > { %387 = vst.msk [vmem:[#allocation2 + $0x6] sm:$0x1] %vm330_vm3, %v382_v29  ;;  %379 = vst.msk [vmem:[#allocation2 + $0x5] sm:$0x1] %vm330_vm3, %v374_v30 }
 0x199   : > { %v390_v31 = vpop.permute.xlu0 %389  ;;  %v344_v32 = vpop.permute.xlu1 %343 }
 0x19a   : > { %395 = vst.msk [vmem:[#allocation2 + $0x7] sm:$0x1] %vm330_vm3, %v390_v31  ;;  %348 = vst.msk [vmem:[#allocation2 + $0x9] sm:$0x1] %vm330_vm3, %v344_v32 }
 0x19d   : > { %v352_v33 = vpop.permute.xlu0 %351  ;;  %v360_v34 = vpop.permute.xlu1 %359 }
 0x19e   : > { %356 = vst.msk [vmem:[#allocation2 + $0xa] sm:$0x1] %vm330_vm3, %v352_v33  ;;  %364 = vst.msk [vmem:[#allocation2 + $0xb] sm:$0x1] %vm330_vm3, %v360_v34 }
 0x1a1   : > { %v368_v35 = vpop.permute.xlu0 %367  ;;  %v376_v36 = vpop.permute.xlu1 %375  ;;  %v400_v37 = vld [vmem:[#allocation2] sm:$0xff] }
 0x1a2   : > { %372 = vst.msk [vmem:[#allocation2 + $0xc] sm:$0x1] %vm330_vm3, %v368_v35  ;;  %380 = vst.msk [vmem:[#allocation2 + $0xd] sm:$0x1] %vm330_vm3, %v376_v36  ;;  %877 = vmatprep.subr.mxu1 %v400_v37 }
 0x1a3   : > { %878 = vmatpush3.msra.mxu1 %v400_v37 }
 0x1a4   : > { %880 = vmatmul.mubr.msk.f32.vlgmr.msra.gmra.mrb[0].mxu1 %vm401_vm4, %v398_v38 }
 0x1a5   : > { %v384_v39 = vpop.permute.xlu0 %383  ;;  %v392_v40 = vpop.permute.xlu1 %391  ;;  %889 = vmatprep.mubr.msk.f32.mxu1 %vm401_vm4, %v397_v24 }
 0x1a6   : > { %388 = vst.msk [vmem:[#allocation2 + $0xe] sm:$0x1] %vm330_vm3, %v384_v39  ;;  %396 = vst.msk [vmem:[#allocation2 + $0xf] sm:$0x1] %vm330_vm3, %v392_v40 }
 0x1ad   : > { %v574_v41 = vld [vmem:[#allocation2 + $0x8] sm:$0xff] }
 0x1ae   : > { %887 = vmatprep.subr.mxu1 %v574_v41 }
 0x1af   : > { %888 = vmatpush3.msra.mxu1 %v574_v41 }
 0x1b0   : > { %890 = vmatmul.mubr.msk.f32.vlgmr.msra.gmra.mrb[2].mxu1 %vm401_vm4, %v398_v38 }
 0x277   : > { %v881_v43 = vpop.f32.mrb[0].mxu1 }
 0x278   : > { %v474_v44 = vpop.f32.mrb[1].mxu1 }
 0x279   : > { %884 = vmatprep.mubr.msk.f32.mxu0 %vm401_vm4, %v474_v44 }
 0x27a   : > { %885 = vmatmul.mubr.msk.f32.vlgmr.msra.gmra.mrb[2].mxu0 %vm401_vm4, %v881_v43 }
 0x27b   : > { %893 = vmatpush3.msra.mxu0 %v399_v42 }
 0x283   : > { %v891_v45 = vpop.f32.mrb[2].mxu1 }
 0x284   : > { %v641_v46 = vpop.f32.mrb[3].mxu1 }
 0x285   : > { %894 = vmatprep.mubr.msk.f32.mxu0 %vm401_vm4, %v641_v46 }
 0x286   : > { %895 = vmatmul.mubr.msk.f32.vlgmr.msra.gmra.mrb[4].mxu0 %vm401_vm4, %v891_v45 }
 0x34d   : > { %v886_v47 = vpop.f32.mrb[2].mxu0 }
 0x34e   : > { %vm565_vm5 = vcmp.ge.f32.partialorder %v886_v47, 0.0  ;;  %v567_v48 = vmul.f32 0.1, %v886_v47  ;;  %v555_v49 = vpop.f32.mrb[3].mxu0 }
 0x34f   : > { %vm564_vm7 = vcmp.ge.f32.partialorder %v555_v49, 0.0  ;;  %v566_v50 = vmul.f32 0.1, %v555_v49 }
 0x350   : > { %v569_v51 = vsel %vm565_vm5, %v886_v47, %v567_v48 }
 0x351   : > { %572 = vst.msk [vmem:[%s215_s8 + $0x8] sm:$0xff] %vm570_vm6, %v569_v51  ;;  %v568_v52 = vsel %vm564_vm7, %v555_v49, %v566_v50 }
 0x352   : > { %571 = vst.msk [vmem:[%s215_s8] sm:$0xff] %vm570_vm6, %v568_v52 }
 0x359   : > { %v896_v53 = vpop.f32.mrb[4].mxu0 }
 0x35a   : > { %vm732_vm8 = vcmp.ge.f32.partialorder %v896_v53, 0.0  ;;  %v734_v54 = vmul.f32 0.1, %v896_v53  ;;  %v722_v55 = vpop.f32.mrb[5].mxu0 }
 0x35b   : > { %vm731_vm9 = vcmp.ge.f32.partialorder %v722_v55, 0.0  ;;  %v733_v56 = vmul.f32 0.1, %v722_v55 }
 0x35c   : > { %v736_v57 = vsel %vm732_vm8, %v896_v53, %v734_v54 }
 0x35d   : > { %850 = vst.msk [vmem:[%s215_s8 + $0x18] sm:$0xff] %vm570_vm6, %v736_v57  ;;  %v735_v58 = vsel %vm731_vm9, %v722_v55, %v733_v56 }
 0x35e   : > { %849 = vst.msk [vmem:[%s215_s8 + $0x10] sm:$0xff] %vm570_vm6, %v735_v58 }
 0x35f   : > { %1000 = shalt.err (!%p997_p2)
}
 0x360   : > { %s1001_s6 = scalar_lea.hbm %s1253_s23, 512  ;;  %s1005_s14 = scalar_lea.hbm %s1303_s4, 1024 }
 0x361   : > { %p1002_p4 = scmp.ne.s32.totalorder %s1253_s23, %s1001_s6  ;;  %p1006_p9 = scmp.lt.u32.totalorder %s1253_s23, %s1303_s4 }
 0x362   : > { %p1007_p1 = scmp.lt.u32.totalorder %s1005_s14, %s1001_s6  ;;  %p1009_p6 = scmp.lt.u32.totalorder %s1001_s6, %s1253_s23 }
 0x363   : > { %p1003_p5 = pnand %p1002_p4, %p1310_p11 }
 0x364   : > { %p1008_p3 = por %p1007_p1, %p1006_p9 }
 0x365   : > { %p1004_p7 = pneg %p1003_p5 }
 0x366   : > { %p1010_p12 = por %p1009_p6, %p1008_p3 }
 0x368   : > { %p1011_p13 = pnand %p1010_p12, %p1004_p7 }
 0x36a   : > { %1014 = shalt.err (!%p1011_p13)
}
 0x36b   : > { %s1069_s8 = smov 128   ;;  %s1070_s26 = smov 8  }
 0x36c   : > { %899 = dma.vmem_to_hbm [thread:$0]  (%p1310_p11), %s1248_s10, 512, %s1253_s23, %s741_s19, %s1069_s8, %s1069_s8, %s1070_s26  }
 0x36d PF: > { %s769_s11 = sand.u32 1, %s1041_s15   ;;  %p1311_p8 = scmp.ne.s32.totalorder %s1308_s28, 0 }
 0x36e   : > { %p1312_p10 = scmp.ge.s32.totalorder %s1053_s18, 2  ;;  %s770_s12 = scalar_lea.sflag [#allocation5], %s769_s11 }
 0x370   : > { %p906_p0 = pnand %p1312_p10, %p1311_p8 }
 0x372   : > { %1036 = dma.done.wait (!%p906_p0), %s770_s12, 512  }
 0x373   : > { %1038 = vsyncadd (!%p906_p0), %s770_s12, 4294966784  ;;  %p17_p2 = scmp.ge.s32.totalorder %s1121_s21, 4   ;;  %s1313_s15 = smov %s1045_s16 }
 0x374   : > { %s1314_s16 = smov %s1049_s17  ;;  %s1315_s17 = smov %s1133_s24 }
 0x375   : > { %s1316_s18 = smov %s1121_s21  ;;  %19 = sbr.rel (!%p17_p2) target bundleno = 5 (0x5), region = 86 }
 0x37c   :  { %775 = vsyncpa [#allocation4], 1 }
 0x37d   :  { %777 = vsyncpa [#allocation4 + $0x1], 1 }
 0x37e   :  { %778 = vsyncpa [#allocation5], 1 }
 0x37f   :  { %780 = vsyncpa [#allocation5 + $0x1], 1 }

</bundles_post_ra>
